<compile_context>
chip_gen: v7x
topology: tpu7x:2x2x1
jax: 0.10.0
libtpu: 0.0.40
codegen_flags: <defaults>
</compile_context>

<pallas_src>
import functools

import jax
import jax.numpy as jnp
import numpy as np
from jax import lax
from jax.experimental import pallas as pl
from jax.experimental.pallas import tpu as pltpu


# ----------------------------------------------------------------------------
# pltpu.roll sign-convention probe (cached): True iff pltpu.roll == jnp.roll.
# ----------------------------------------------------------------------------
_ROLL_MATCHES_JNP = None


def _roll_matches_jnp_roll():
    global _ROLL_MATCHES_JNP
    if _ROLL_MATCHES_JNP is None:
        def probe(x_ref, o_ref):
            o_ref[...] = pltpu.roll(x_ref[...], 1, 1)

        x = jnp.broadcast_to(jnp.arange(128, dtype=jnp.float32), (8, 128))
        out = pl.pallas_call(
            probe, out_shape=jax.ShapeDtypeStruct((8, 128), jnp.float32))(x)
        _ROLL_MATCHES_JNP = bool(float(out[0, 1]) == 0.0)
    return _ROLL_MATCHES_JNP


# ----------------------------------------------------------------------------
# Fused kernel
# ----------------------------------------------------------------------------
def _srcnn_kernel(x_ref, w1_ref, b1_ref, w2_ref, b2_ref, w3_ref, b3_ref,
                  m1_ref, m3_ref, o_ref, patch_s, *,
                  W, Cin, Cout, K1, K3, mm_dtype, roll_like_jnp):
    """Fused SRCNN for one grid step (B images folded into the lane dim).

    x_ref  : (1, Cin, L)          L = B*H*W, lane-dense input
    w1_ref : (C1, K1*K1*Cin)      layer-1 weights, tap-major (ky, kx, cin)
    w2_ref : (C2, C1)             layer-2 (1x1) weights
    w3_ref : (Cout, C2, K3*K3)    layer-3 weights (per-tap columns)
    b*_ref : (C*, 1) f32          biases
    m1_ref : (K1*K1, L) f32       layer-1 per-tap border masks
    m3_ref : (K3*K3, L) f32       layer-3 per-tap border masks
    o_ref  : (1, Cout, L)
    patch_s: VMEM (K1*K1*Cin, L)  layer-1 im2col patch
    """
    L = x_ref.shape[-1]
    P1, P3 = K1 // 2, K3 // 2

    def shifted(v, d):
        # Returns v[:, i + d]; the wrap-around is harmless because every
        # out-of-image lane is zeroed by the border masks.
        if d == 0:
            return v
        t = -d if roll_like_jnp else d
        return pltpu.roll(v, t % L, 1)

    # ---- layer 1: 9x9 conv, Cin -> C1, ReLU (im2col -> one MXU matmul) -----
    x = x_ref[0]                                               # (Cin, L) f32
    for ky in range(K1):
        for kx in range(K1):
            row = ky * K1 + kx
            d = (ky - P1) * W + (kx - P1)
            tap = shifted(x, d) * m1_ref[row:row + 1, :]       # (Cin, L)
            patch_s[row * Cin:(row + 1) * Cin, :] = tap

    y1 = jnp.dot(w1_ref[...], patch_s[...].astype(mm_dtype),
                 preferred_element_type=jnp.float32)
    y1 = jnp.maximum(y1 + b1_ref[...], 0.0)                    # (C1, L) f32

    # ---- layer 2: 1x1 conv, C1 -> C2, ReLU (one MXU matmul) ----------------
    y2 = jnp.dot(w2_ref[...], y1.astype(mm_dtype),
                 preferred_element_type=jnp.float32)
    y2 = jnp.maximum(y2 + b2_ref[...], 0.0)                    # (C2, L) f32

    # ---- layer 3: 5x5 conv, C2 -> Cout (tiny Cout -> VPU tap accumulation) -
    w3 = w3_ref[...]                                           # (Cout, C2, KK)
    acc = [None] * Cout
    for ky in range(K3):
        for kx in range(K3):
            row = ky * K3 + kx
            d = (ky - P3) * W + (kx - P3)
            tap = shifted(y2, d) * m3_ref[row:row + 1, :]      # (C2, L)
            for co in range(Cout):
                contrib = tap * w3[co, :, row:row + 1]         # (C2, L)
                acc[co] = contrib if acc[co] is None else acc[co] + contrib
    rows = [jnp.sum(acc[co], axis=0, keepdims=True) + b3_ref[co:co + 1, :]
            for co in range(Cout)]
    o_ref[0] = rows[0] if Cout == 1 else jnp.concatenate(rows, axis=0)


# ----------------------------------------------------------------------------
# Wrapper
# ----------------------------------------------------------------------------
def _tap_masks(H, W, K, B):
    """(K*K, B*H*W) f32: 1 where tap (ky,kx) reads inside the image, else 0."""
    P = K // 2
    ys = np.repeat(np.arange(H), W)
    xs = np.tile(np.arange(W), H)
    rows = []
    for ky in range(K):
        for kx in range(K):
            dy, dx = ky - P, kx - P
            ok = ((ys + dy >= 0) & (ys + dy < H) &
                  (xs + dx >= 0) & (xs + dx < W))
            rows.append(np.tile(ok.astype(np.float32), B))
    return jnp.asarray(np.stack(rows, axis=0))


def _vmem_limit_bytes():
    try:
        kind = jax.devices()[0].device_kind.lower()
    except Exception:
        return None
    if "v7" in kind:
        return 48 * 1024 * 1024          # headroom within v7x's 64 MiB VMEM
    if any(g in kind for g in ("v4", "v5", "v6")):
        return 100 * 1024 * 1024         # 128 MiB physical on these parts
    return None


def srcnn_forward(x_nchw, params, *, block_batch=None, use_bf16=True):
    """x_nchw: (N, Cin, H, W) float32 -> (N, Cout, H, W) float32."""
    N, Cin, H, W = x_nchw.shape
    w1, b1 = params["w1"], params["b1"]
    w2, b2 = params["w2"], params["b2"]
    w3, b3 = params["w3"], params["b3"]
    K1, _, _, C1 = w1.shape
    _, _, _, C2 = w2.shape
    K3, _, _, Cout = w3.shape
    HW = H * W

    if block_batch is None:
        # Fold a few images into the lane dim per step, but keep >=2 grid steps
        # when possible (both v7x TensorCores busy via "parallel" sharding).
        lane_cap = max(1, 4096 // HW)
        vmem_cap = max(1, (8 * 1024 * 1024) // (4 * K1 * K1 * Cin * HW))
        block_batch = max(1, min(lane_cap, vmem_cap, N // 2)) if N > 1 else 1
    B = int(block_batch)
    steps = -(-N // B)
    Npad = steps * B
    L = B * HW

    if Npad != N:
        x_nchw = jnp.pad(x_nchw, ((0, Npad - N), (0, 0), (0, 0), (0, 0)))
    # (steps, Cin, B*H*W): images laid out back-to-back along lanes.
    xr = (x_nchw.reshape(steps, B, Cin, HW)
          .transpose(0, 2, 1, 3)
          .reshape(steps, Cin, L))

    mm_dtype = jnp.bfloat16 if use_bf16 else jnp.float32
    # HWIO -> matmul layouts matching the in-kernel tap order (ky, kx, cin).
    w1m = jnp.transpose(w1, (3, 0, 1, 2)).reshape(C1, K1 * K1 * Cin).astype(mm_dtype)
    w2m = jnp.transpose(w2, (3, 0, 1, 2)).reshape(C2, C1).astype(mm_dtype)
    w3v = jnp.transpose(w3, (3, 2, 0, 1)).reshape(Cout, C2, K3 * K3).astype(jnp.float32)
    b1c = b1.reshape(C1, 1).astype(jnp.float32)
    b2c = b2.reshape(C2, 1).astype(jnp.float32)
    b3c = b3.reshape(Cout, 1).astype(jnp.float32)
    m1 = _tap_masks(H, W, K1, B)
    m3 = _tap_masks(H, W, K3, B)

    kernel = functools.partial(
        _srcnn_kernel, W=W, Cin=Cin, Cout=Cout, K1=K1, K3=K3,
        mm_dtype=mm_dtype, roll_like_jnp=_roll_matches_jnp_roll())

    out = pl.pallas_call(
        kernel,
        out_shape=jax.ShapeDtypeStruct((steps, Cout, L), jnp.float32),
        grid=(steps,),
        in_specs=[
            pl.BlockSpec((1, Cin, L), lambda s: (s, 0, 0)),
            pl.BlockSpec((C1, K1 * K1 * Cin), lambda s: (0, 0)),
            pl.BlockSpec((C1, 1), lambda s: (0, 0)),
            pl.BlockSpec((C2, C1), lambda s: (0, 0)),
            pl.BlockSpec((C2, 1), lambda s: (0, 0)),
            pl.BlockSpec((Cout, C2, K3 * K3), lambda s: (0, 0, 0)),
            pl.BlockSpec((Cout, 1), lambda s: (0, 0)),
            pl.BlockSpec((K1 * K1, L), lambda s: (0, 0)),
            pl.BlockSpec((K3 * K3, L), lambda s: (0, 0)),
        ],
        out_specs=pl.BlockSpec((1, Cout, L), lambda s: (s, 0, 0)),
        scratch_shapes=[pltpu.VMEM((K1 * K1 * Cin, L), jnp.float32)],
        compiler_params=pltpu.CompilerParams(
            dimension_semantics=("parallel",),
            vmem_limit_bytes=_vmem_limit_bytes()),
    )(xr, w1m, b1c, w2m, b2c, w3v, b3c, m1, m3)

    out = (out.reshape(steps, Cout, B, HW)
           .transpose(0, 2, 1, 3)
           .reshape(Npad, Cout, H, W))
    return out[:N]


# ----------------------------------------------------------------------------
# Params + pure-JAX reference
# ----------------------------------------------------------------------------
def init_srcnn_params(key, in_channels=1, out_channels=1):
    k1, k2, k3, k4, k5, k6 = jax.random.split(key, 6)
    return {
        "w1": jax.random.normal(k1, (9, 9, in_channels, 64), jnp.float32) * 0.05,
        "b1": jax.random.normal(k2, (64,), jnp.float32) * 0.05,
        "w2": jax.random.normal(k3, (1, 1, 64, 32), jnp.float32) * 0.05,
        "b2": jax.random.normal(k4, (32,), jnp.float32) * 0.05,
        "w3": jax.random.normal(k5, (5, 5, 32, out_channels), jnp.float32) * 0.05,
        "b3": jax.random.normal(k6, (out_channels,), jnp.float32) * 0.05,
    }


def srcnn_reference(x_nchw, params):
    x = jnp.transpose(x_nchw, (0, 2, 3, 1))
    dn = lax.conv_dimension_numbers(x.shape, params["w1"].shape,
                                    ("NHWC", "HWIO", "NHWC"))

    def conv(x, w, b, pad):
        y = lax.conv_general_dilated(x, w, (1, 1), [(pad, pad), (pad, pad)],
                                     dimension_numbers=dn,
                                     precision=lax.Precision.HIGHEST)
        return y + b.reshape(1, 1, 1, -1)

    x = jax.nn.relu(conv(x, params["w1"], params["b1"], 4))
    x = jax.nn.relu(conv(x, params["w2"], params["b2"], 0))
    x = conv(x, params["w3"], params["b3"], 2)
    return jnp.transpose(x, (0, 3, 1, 2))


if __name__ == "__main__":
    key = jax.random.PRNGKey(0)
    kx, kp = jax.random.split(key)

    # batch=2, in_channels=1, spatial 16x16 (NCHW, like the PyTorch module)
    x = jax.random.normal(kx, (2, 1, 16, 16), jnp.float32)
    params = init_srcnn_params(kp, in_channels=1, out_channels=1)

    ref = jax.block_until_ready(srcnn_reference(x, params))

    # f32 MXU path, one image per grid step (2 parallel steps).
    out = jax.block_until_ready(
        srcnn_forward(x, params, block_batch=1, use_bf16=False))
    assert out.shape == (2, 1, 16, 16), out.shape
    err = float(jnp.max(jnp.abs(out - ref)))
    assert jnp.allclose(out, ref, atol=2e-3, rtol=2e-3), f"f32 max err {err}"

    # bf16 matmul inputs (f32 accumulate), both images folded into one step.
    out_bf16 = jax.block_until_ready(
        srcnn_forward(x, params, block_batch=2, use_bf16=True))
    err_bf16 = float(jnp.max(jnp.abs(out_bf16 - ref)))
    assert jnp.allclose(out_bf16, ref, atol=2e-2, rtol=2e-2), \
        f"bf16 max err {err_bf16}"

    print("KERNEL_OK")
</pallas_src>

<mosaic_0001>
module attributes {stable_mosaic.version = 11 : i64} {
  func.func @probe(%arg0: memref<8x128xf32, #tpu.memory_space<vmem>>, %arg1: memref<8x128xf32, #tpu.memory_space<vmem>>) attributes {dimension_semantics = [], scalar_prefetch = 0 : i64, scratch_operands = 0 : i64, tpu.core_type = #tpu.core_type<tc>} {
    %c0 = arith.constant 0 : index
    %c0_0 = arith.constant 0 : index
    %0 = vector.load %arg0[%c0, %c0_0] : memref<8x128xf32, #tpu.memory_space<vmem>>, vector<8x128xf32>
    %c1_i32 = arith.constant 1 : i32
    %1 = tpu.dynamic_rotate %0 by %c1_i32 dim 1 : vector<8x128xf32>, i32 -> vector<8x128xf32>
    %c0_1 = arith.constant 0 : index
    %c0_2 = arith.constant 0 : index
    %2 = vector.load %arg1[%c0_1, %c0_2] : memref<8x128xf32, #tpu.memory_space<vmem>>, vector<8x128xf32>
    tpu.vector_store %arg1[%c0_1, %c0_2], %1 {strides = array<i32>} : memref<8x128xf32, #tpu.memory_space<vmem>>, vector<8x128xf32>,
    return
  }
}

</mosaic_0001>

<bundles_post_ra>
// kernel: tpu_custom_call.1
= control target key start
LH: loop header
LB: loop body
LE: loop exit
PB: predicated region body
PF: predicated region fallthrough
CT: control target
= control target key end

     0   :  { %6 = vsyncpa [#allocation3], 0  ;;  %s128_s0 = inlined_call_operand.hbm [shape: f32[8,128], index: 0, kind: input, shape index: {}]   ;;  %s129_s1 = inlined_call_operand.hbm [shape: f32[8,128], index: 1, kind: output, shape index: {}]  }
   0x1   :  { %7 = vsyncpa [#allocation4], 0  ;;  %s91_s6 = smov [#allocation2]   ;;  %s43_s10 = scalar_lea.hbm %s128_s0, 128 }
   0x2   :  { %s14_s7 = sshll.u32 %s91_s6, 4  ;;  %p44_p0 = scmp.ne.s32.totalorder %s128_s0, %s43_s10  ;;  %s15_s7 = int_to_ptr.vmem [resolvable:$true] %s14_s7 }
   0x3   :  { %p47_p1 = scmp.lt.u32.totalorder %s43_s10, %s128_s0 }
   0x5   :  { %p49_p2 = pnand %p47_p1, %p44_p0 }
   0x7   :  { %52 = shalt.err (!%p49_p2)
}
   0x8   :  { %s53_s15 = scalar_lea.vmem %s15_s7, 128  ;;  %p58_p4 = scmp.lt.s32.totalorder %s15_s7, %s15_s7 }
   0x9   :  { %p54_p3 = scmp.ne.s32.totalorder %s15_s7, %s53_s15  ;;  %p59_p5 = scmp.lt.s32.totalorder %s53_s15, %s53_s15 }
   0xb   :  { %p60_p6 = por %p59_p5, %p58_p4 }
   0xd   :  { %p61_p7 = pnand %p60_p6, %p54_p3 }
   0xf   :  { %64 = shalt.err (!%p61_p7)
}
  0x10   :  { %17 = dma.hbm_to_vmem [thread:$0]  %s128_s0, 128, %s15_s7, [#allocation3]  }
  0x11   :  { %87 = dma.done.wait [#allocation3], 128  }
  0x12   :  { %88 = vsyncadd [#allocation3], 4294967168  ;;  %v21_v0 = vld [vmem:[#allocation2] sm:$0xff]  ;;  %s92_s18 = smov 1   ;;  %s93_s19 = smov [#allocation5]  }
  0x13   :  { %22 = vrot.lane.b32.xlu0 %v21_v0, %s92_s18  ;;  %s31_s20 = sshll.u32 %s93_s19, 4  ;;  %s32_s20 = int_to_ptr.vmem [resolvable:$true] %s31_s20 }
  0x14   :  { %s65_s21 = scalar_lea.vmem %s32_s20, 128  ;;  %p70_p9 = scmp.lt.s32.totalorder %s32_s20, %s32_s20 }
  0x15   :  { %p66_p8 = scmp.ne.s32.totalorder %s32_s20, %s65_s21  ;;  %p71_p10 = scmp.lt.s32.totalorder %s65_s21, %s65_s21 }
  0x17   :  { %p72_p11 = por %p71_p10, %p70_p9 }
  0x19   :  { %p73_p12 = pnand %p72_p11, %p66_p8 }
  0x85   :  { %v23_v1 = vpop.permute.xlu0 %22 }
  0x86   :  { %24 = vst [vmem:[#allocation5] sm:$0xff] %v23_v1 }
  0x87   :  { %76 = shalt.err (!%p73_p12)
}
  0x88   :  { %s77_s0 = scalar_lea.hbm %s129_s1, 128 }
  0x89   :  { %p78_p13 = scmp.ne.s32.totalorder %s129_s1, %s77_s0  ;;  %p81_p0 = scmp.lt.u32.totalorder %s77_s0, %s129_s1 }
  0x8b   :  { %p83_p1 = pnand %p81_p0, %p78_p13 }
  0x8d   :  { %86 = shalt.err (!%p83_p1)
}
  0x8e   :  { %34 = dma.vmem_to_hbm [thread:$0]  %s32_s20, 128, %s129_s1, [#allocation4]  }
  0x8f   :  { %89 = dma.done.wait [#allocation4], 128  }
  0x90   :  { %90 = vsyncadd [#allocation4], 4294967168 }
  0x91   :  { %38 = vsyncpa [#allocation3], 1 }
  0x92   :  { %39 = vsyncpa [#allocation4], 1 }

</bundles_post_ra>
